<compile_context>
chip_gen: v6e
topology: v6e:2x2x1
jax: 0.10.0
libtpu: 0.0.40
codegen_flags: <defaults>
</compile_context>

<pallas_src>
import jax
import jax.numpy as jnp
import numpy as np
from jax.experimental import pallas as pl
from jax.experimental.pallas import tpu as pltpu


def cbam_kernel(x_ref, w1t_ref, w2t_ref, wsa_ref, o_ref):
    # Hoist SMEM scalar reads off the vector critical path.
    w_avg = wsa_ref[0]
    w_max = wsa_ref[1]

    # Load in native dtype, compute in f32 (v5e has no bf16 VPU/EUP).
    x = x_ref[...].astype(jnp.float32)                                     # (TB, C)

    # ---- ChannelAttention ----
    # avg_pool == max_pool == identity on 1x1 spatial -> sum of branches = 2*branch.
    h = jnp.dot(x, w1t_ref[...], preferred_element_type=jnp.float32)       # (TB, C//r)
    h = jnp.maximum(h, 0.0)                                                 # ReLU
    branch = jnp.dot(h, w2t_ref[...], preferred_element_type=jnp.float32)  # (TB, C)
    out = x * jax.nn.sigmoid(2.0 * branch)                                  # (TB, C)

    # ---- SpatialAttention: 7x7 conv collapsed to its center tap on 1x1 input ----
    avg_c = jnp.mean(out, axis=1, keepdims=True)                            # (TB, 1)
    max_c = jnp.max(out, axis=1, keepdims=True)                             # (TB, 1)
    sa = jax.nn.sigmoid(w_avg * avg_c + w_max * max_c)                      # (TB, 1)

    o_ref[...] = (out * sa).astype(o_ref.dtype)


_TB_MAX = 1024  # ~86% of HBM roofline on v6e; 256 KB/buffer -> fits every gen's VMEM.


def _pick_batch_tile(B):
    """No divisor search, no tiny-tile fallback, no unbounded single block."""
    if B <= 512:
        return B                               # latency-bound: one block, one step
    if B <= 2 * _TB_MAX:
        half = -(-B // 2)                      # exactly 2 steps -> both v7x TCs busy
        return -(-half // 8) * 8               # round up to sublane multiple
    return _TB_MAX                             # long grid, pipelined


def cbam_forward(x, fc1_w, fc2_w, sa_conv_w):
    """x: (B, C, 1, 1) NCHW (any float dtype).
    fc1_w: (C//r, C, 1, 1), fc2_w: (C, C//r, 1, 1), sa_conv_w: (1, 2, k, k)."""
    B, C, H, W = x.shape
    assert H == 1 and W == 1, "CBAM forward requires 1x1 spatial (x.view(B,C,1,1))"
    Ch = fc1_w.shape[0]
    k = sa_conv_w.shape[-1]

    # Native dtype in/out: the f32 upcast happens inside the kernel.
    x2 = x.reshape(B, C)
    # Pre-transpose tiny weights at trace time -> zero in-kernel transposes:
    #   h = x @ w1t, branch = h @ w2t.
    w1t = fc1_w.reshape(Ch, C).astype(jnp.float32).T                  # (C, C//r)
    w2t = fc2_w.reshape(C, Ch).astype(jnp.float32).T                  # (C//r, C)
    # Center tap of the kxk conv; ordering matches concat([mean, max]).
    wsa = sa_conv_w[0, :, k // 2, k // 2].astype(jnp.float32)         # (2,)

    tb = _pick_batch_tile(B)
    steps = pl.cdiv(B, tb)
    # Uneven last block: OOB rows are padded on load and their writes discarded;
    # all compute is row-independent, so valid rows are unaffected.

    x_spec_kwargs = {}
    if steps >= 3:
        # Deeper input buffering keeps the DMA engine busy on long grids (v7x HBM).
        x_spec_kwargs["pipeline_mode"] = pl.Buffered(3)

    out = pl.pallas_call(
        cbam_kernel,
        out_shape=jax.ShapeDtypeStruct((B, C), x.dtype),
        grid=(steps,),
        in_specs=[
            pl.BlockSpec((tb, C), lambda i: (i, 0), **x_spec_kwargs),
            pl.BlockSpec((C, Ch), lambda i: (0, 0)),
            pl.BlockSpec((Ch, C), lambda i: (0, 0)),
            pl.BlockSpec(memory_space=pltpu.MemorySpace.SMEM),
        ],
        out_specs=pl.BlockSpec((tb, C), lambda i: (i, 0)),
        compiler_params=pltpu.CompilerParams(
            dimension_semantics=("parallel",)),
    )(x2, w1t, w2t, wsa)
    return out.reshape(B, C, 1, 1)


def cbam_reference(x, fc1_w, fc2_w, sa_conv_w):
    """Pure-JAX reference mirroring the PyTorch ops literally (incl. full 7x7 conv)."""
    B, C = x.shape[0], x.shape[1]
    xv = x.reshape(B, C, 1, 1).astype(jnp.float32)
    w1 = fc1_w.reshape(fc1_w.shape[0], C).astype(jnp.float32)
    w2 = fc2_w.reshape(C, fc2_w.shape[1]).astype(jnp.float32)
    v = xv.reshape(B, C)
    branch = jnp.maximum(v @ w1.T, 0.0) @ w2.T
    ca = jax.nn.sigmoid(branch + branch).reshape(B, C, 1, 1)
    out = xv * ca
    inp = jnp.concatenate(
        [out.mean(axis=1, keepdims=True), out.max(axis=1, keepdims=True)], axis=1
    )  # (B, 2, 1, 1)
    pad = sa_conv_w.shape[-1] // 2
    conv = jax.lax.conv_general_dilated(
        inp, sa_conv_w.astype(jnp.float32), (1, 1), [(pad, pad), (pad, pad)],
        dimension_numbers=("NCHW", "OIHW", "NCHW"),
    )  # (B, 1, 1, 1)
    sa = jax.nn.sigmoid(conv)
    return out * sa


if __name__ == "__main__":
    B, C, ratio = 8, 64, 16
    Ch = C // ratio  # 4

    key = jax.random.PRNGKey(0)
    kx, k1, k2, k3 = jax.random.split(key, 4)

    x = jax.random.normal(kx, (B, C, 1, 1), dtype=jnp.float32)
    fc1_w = 0.1 * jax.random.normal(k1, (Ch, C, 1, 1), dtype=jnp.float32)
    fc2_w = 0.1 * jax.random.normal(k2, (C, Ch, 1, 1), dtype=jnp.float32)
    sa_conv_w = 0.1 * jax.random.normal(k3, (1, 2, 7, 7), dtype=jnp.float32)

    # f32 path: exact check against the literal (full 7x7 conv) reference.
    y = jax.block_until_ready(cbam_forward(x, fc1_w, fc2_w, sa_conv_w))
    y_ref = jax.block_until_ready(cbam_reference(x, fc1_w, fc2_w, sa_conv_w))
    np.testing.assert_allclose(np.asarray(y), np.asarray(y_ref), rtol=1e-4, atol=1e-4)

    # bf16 I/O path (native-dtype HBM traffic), compared against the f32 reference
    # evaluated on the bf16-rounded input.
    x_bf = x.astype(jnp.bfloat16)
    y_bf = jax.block_until_ready(cbam_forward(x_bf, fc1_w, fc2_w, sa_conv_w))
    assert y_bf.dtype == jnp.bfloat16
    y_ref_bf = jax.block_until_ready(cbam_reference(x_bf, fc1_w, fc2_w, sa_conv_w))
    np.testing.assert_allclose(np.asarray(y_bf, dtype=np.float32),
                               np.asarray(y_ref_bf), rtol=5e-2, atol=5e-2)

    print("KERNEL_OK")
</pallas_src>

<mosaic_0001>
module attributes {stable_mosaic.version = 11 : i64} {
  func.func @cbam_kernel(%arg0: i32, %arg1: memref<8x64xf32, #tpu.memory_space<vmem>>, %arg2: memref<64x4xf32, #tpu.memory_space<vmem>>, %arg3: memref<4x64xf32, #tpu.memory_space<vmem>>, %arg4: memref<2xf32, #tpu.memory_space<smem>>, %arg5: memref<8x64xf32, #tpu.memory_space<vmem>>) attributes {dimension_semantics = [#tpu.dimension_semantics<parallel>], iteration_bounds = array<i64: 1>, scalar_prefetch = 0 : i64, scratch_operands = 0 : i64, tpu.core_type = #tpu.core_type<tc>, window_params = [{transform_indices = @transform_0, window_bounds = array<i64: 8, 64>}, {pipeline_mode = #tpu.pipeline_mode<synchronous>, transform_indices = @transform_1, window_bounds = array<i64: 64, 4>}, {pipeline_mode = #tpu.pipeline_mode<synchronous>, transform_indices = @transform_2, window_bounds = array<i64: 4, 64>}, {transform_indices = @transform_3, window_bounds = array<i64: 2>}, {transform_indices = @transform_4, window_bounds = array<i64: 8, 64>}]} {
    %c0 = arith.constant 0 : index
    %0 = memref.load %arg4[%c0] : memref<2xf32, #tpu.memory_space<smem>>
    %c1 = arith.constant 1 : index
    %1 = memref.load %arg4[%c1] : memref<2xf32, #tpu.memory_space<smem>>
    %c0_0 = arith.constant 0 : index
    %c0_1 = arith.constant 0 : index
    %2 = vector.load %arg1[%c0_0, %c0_1] : memref<8x64xf32, #tpu.memory_space<vmem>>, vector<8x64xf32>
    %c0_2 = arith.constant 0 : index
    %c0_3 = arith.constant 0 : index
    %3 = vector.load %arg2[%c0_2, %c0_3] : memref<64x4xf32, #tpu.memory_space<vmem>>, vector<64x4xf32>
    %cst = arith.constant dense<0.000000e+00> : vector<8x4xf32>
    %4 = tpu.matmul %2, %3, %cst {dimension_numbers = #tpu.dot_dimension_numbers<[1], [0], [0], [1], [0, 0, 1, 1], [], []>} : vector<8x64xf32>, vector<64x4xf32>, vector<8x4xf32> -> vector<8x4xf32>
    %cst_4 = arith.constant 0.000000e+00 : f32
    %5 = vector.broadcast %cst_4 : f32 to vector<8x4xf32>
    %6 = arith.maximumf %4, %5 : vector<8x4xf32>
    %c0_5 = arith.constant 0 : index
    %c0_6 = arith.constant 0 : index
    %7 = vector.load %arg3[%c0_5, %c0_6] : memref<4x64xf32, #tpu.memory_space<vmem>>, vector<4x64xf32>
    %cst_7 = arith.constant dense<0.000000e+00> : vector<8x64xf32>
    %8 = tpu.matmul %6, %7, %cst_7 {dimension_numbers = #tpu.dot_dimension_numbers<[1], [0], [0], [1], [0, 0, 1, 1], [], []>} : vector<8x4xf32>, vector<4x64xf32>, vector<8x64xf32> -> vector<8x64xf32>
    %cst_8 = arith.constant 2.000000e+00 : f32
    %9 = vector.broadcast %cst_8 : f32 to vector<8x64xf32>
    %10 = arith.mulf %9, %8 : vector<8x64xf32>
    %11 = arith.negf %10 : vector<8x64xf32>
    %12 = math.exp %11 : vector<8x64xf32>
    %cst_9 = arith.constant 1.000000e+00 : f32
    %13 = vector.broadcast %cst_9 : f32 to vector<8x64xf32>
    %14 = arith.addf %13, %12 : vector<8x64xf32>
    %15 = arith.divf %13, %14 : vector<8x64xf32>
    %16 = arith.mulf %2, %15 : vector<8x64xf32>
    %cst_10 = arith.constant dense<0.000000e+00> : vector<8xf32>
    %17 = vector.multi_reduction <add>, %16, %cst_10 [1] : vector<8x64xf32> to vector<8xf32>
    %18 = vector.shape_cast %17 : vector<8xf32> to vector<8x1xf32>
    %cst_11 = arith.constant 6.400000e+01 : f32
    %19 = vector.broadcast %cst_11 : f32 to vector<8x1xf32>
    %20 = arith.divf %18, %19 : vector<8x1xf32>
    %cst_12 = arith.constant dense<0xFF800000> : vector<8xf32>
    %21 = vector.multi_reduction <maximumf>, %16, %cst_12 [1] : vector<8x64xf32> to vector<8xf32>
    %22 = vector.shape_cast %21 : vector<8xf32> to vector<8x1xf32>
    %23 = vector.broadcast %0 : f32 to vector<8x1xf32>
    %24 = arith.mulf %23, %20 : vector<8x1xf32>
    %25 = vector.broadcast %1 : f32 to vector<8x1xf32>
    %26 = arith.mulf %25, %22 : vector<8x1xf32>
    %27 = arith.addf %24, %26 : vector<8x1xf32>
    %28 = arith.negf %27 : vector<8x1xf32>
    %29 = math.exp %28 : vector<8x1xf32>
    %cst_13 = arith.constant 1.000000e+00 : f32
    %30 = vector.broadcast %cst_13 : f32 to vector<8x1xf32>
    %31 = arith.addf %30, %29 : vector<8x1xf32>
    %32 = arith.divf %30, %31 : vector<8x1xf32>
    %33 = vector.broadcast %32 : vector<8x1xf32> to vector<8x64xf32>
    %34 = arith.mulf %16, %33 : vector<8x64xf32>
    %c0_14 = arith.constant 0 : index
    %c0_15 = arith.constant 0 : index
    %35 = vector.load %arg5[%c0_14, %c0_15] : memref<8x64xf32, #tpu.memory_space<vmem>>, vector<8x64xf32>
    tpu.vector_store %arg5[%c0_14, %c0_15], %34 {strides = array<i32>} : memref<8x64xf32, #tpu.memory_space<vmem>>, vector<8x64xf32>,
    return
  }
  func.func @transform_0(%arg0: i32) -> (i32, i32) {
    %c0_i32 = arith.constant 0 : i32
    %c0_i32_0 = arith.constant 0 : i32
    return %arg0, %c0_i32 : i32, i32
  }
  func.func @transform_1(%arg0: i32) -> (i32, i32) {
    %c0_i32 = arith.constant 0 : i32
    %c0_i32_0 = arith.constant 0 : i32
    %c0_i32_1 = arith.constant 0 : i32
    return %c0_i32, %c0_i32_0 : i32, i32
  }
  func.func @transform_2(%arg0: i32) -> (i32, i32) {
    %c0_i32 = arith.constant 0 : i32
    %c0_i32_0 = arith.constant 0 : i32
    %c0_i32_1 = arith.constant 0 : i32
    return %c0_i32, %c0_i32_0 : i32, i32
  }
  func.func @transform_3(%arg0: i32) -> i32 {
    %c0_i32 = arith.constant 0 : i32
    %c0_i32_0 = arith.constant 0 : i32
    return %c0_i32 : i32
  }
  func.func @transform_4(%arg0: i32) -> (i32, i32) {
    %c0_i32 = arith.constant 0 : i32
    %c0_i32_0 = arith.constant 0 : i32
    return %arg0, %c0_i32 : i32, i32
  }
}

</mosaic_0001>

<bundles_post_ra>
// kernel: tpu_custom_call.1
= control target key start
LH: loop header
LB: loop body
LE: loop exit
PB: predicated region body
PF: predicated region fallthrough
CT: control target
= control target key end

     0   :  { %9 = vsyncpa [#allocation4], 0  ;;  %s398_s0 = inlined_call_operand.vmem [shape: f32[8,64], index: 0, kind: input, shape index: {}]   ;;  %s399_s1 = inlined_call_operand.vmem [shape: f32[64,4], index: 1, kind: input, shape index: {}]   ;;  %s400_s2 = inlined_call_operand.vmem [shape: f32[4,64], index: 2, kind: input, shape index: {}]   ;;  %s401_s3 = inlined_call_operand.vmem [shape: f32[2], index: 3, kind: input, shape index: {}]   ;;  %s402_s4 = inlined_call_operand.hbm [shape: f32[8,64], index: 4, kind: output, shape index: {}]  }
   0x1   :  { %10 = vsyncpa [#allocation3], 0  ;;  %s23_s17 = sshll.u32 %s401_s3, 4  ;;  %s24_s17 = int_to_ptr.vmem [resolvable:$true] %s23_s17 }
   0x2   :  { %s293_s18 = scalar_lea.vmem %s24_s17, 16  ;;  %p298_p1 = scmp.lt.s32.totalorder %s24_s17, %s24_s17 }
   0x3   :  { %p294_p0 = scmp.ne.s32.totalorder %s24_s17, %s293_s18  ;;  %p299_p2 = scmp.lt.s32.totalorder %s293_s18, %s293_s18 }
   0x5   :  { %p300_p3 = por %p299_p2, %p298_p1 }
   0x7   :  { %p301_p4 = pnand %p300_p3, %p294_p0 }
   0x9   :  { %304 = shalt.err (!%p301_p4)
}
   0xa   :  { %s329_s19 = smov [#allocation2]  }
   0xb   :  { %26 = dma.vmem_to_smem %s24_s17, 16, %s329_s19, [#allocation4]  }
   0xc   :  { %325 = dma.done.wait [#allocation4], 16  }
   0xd   :  { %326 = vsyncadd [#allocation4], 4294967280 }
   0xe   :  { %30 = sfence }
   0xf   :  { %v41_v0 = vld [vmem:[%s399_s1 + $0x38] sm:$0xff]  ;;  %v330_v1 = vmov 0.0   ;;  %v40_v2 = vld [vmem:[%s399_s1 + $0x30] sm:$0xff]  ;;  %vm331_vm0 = vmmov 0   ;;  %v39_v3 = vld [vmem:[%s399_s1 + $0x28] sm:$0xff]  ;;  %vm42_vm1 = vcmask 523264  }
  0x10   :  { %257 = vmatprep.subr.mxu0 %v330_v1  ;;  %273 = vmatprep.mubr.msk.f32.mxu0 %vm331_vm0, %v330_v1  ;;  %v38_v4 = vld [vmem:[%s399_s1 + $0x20] sm:$0xff]  ;;  %v37_v5 = vld [vmem:[%s399_s1 + $0x18] sm:$0xff]  ;;  %v36_v6 = vld [vmem:[%s399_s1 + $0x10] sm:$0xff]  ;;  %vm122_vm2 = vcmask 1043456   ;;  %vm118_vm3 = vcmask 31744  }
  0x11   :  { %258 = vmatpush3.msra.mxu0 %v41_v0  ;;  %276 = vmatprep.subr.mxu1 %v330_v1  ;;  %v35_v7 = vld [vmem:[%s399_s1 + $0x8] sm:$0xff]  ;;  %v34_v8 = vld [vmem:[%s399_s1] sm:$0xff]  ;;  %s240_s1 = sld [smem:[#allocation2 + $0x1]] }
  0x12   :  { %259 = vmatprep.subr.mxu0 %v330_v1  ;;  %278 = vmatprep.mubr.msk.f32.mxu1 %vm331_vm0, %v330_v1  ;;  %v33_v9 = vld [vmem:[%s398_s0] sm:$0xff]  ;;  %s31_s0 = sld [smem:[#allocation2]] }
  0x13   :  { %260 = vmatpush3.msra.mxu0 %v40_v2  ;;  %v117_v10 = vld [vmem:[%s400_s2] sm:$0xf]  ;;  %s332_s2 = smov [#allocation5]  }
  0x14   :  { %261 = vmatprep.subr.mxu0 %v330_v1  ;;  %277 = vmatpush3.msk.msra.mxu1 %vm122_vm2, %v117_v10  ;;  %s231_s13 = sshll.u32 %s332_s2, 4  ;;  %s232_s13 = int_to_ptr.vmem [resolvable:$true] %s231_s13 }
  0x15   :  { %262 = vmatpush3.msra.mxu0 %v39_v3  ;;  %s305_s14 = scalar_lea.vmem %s232_s13, 128  ;;  %p310_p6 = scmp.lt.s32.totalorder %s232_s13, %s232_s13 }
  0x16   :  { %263 = vmatprep.subr.mxu0 %v330_v1  ;;  %p306_p5 = scmp.ne.s32.totalorder %s232_s13, %s305_s14  ;;  %p311_p7 = scmp.lt.s32.totalorder %s305_s14, %s305_s14 }
  0x17   :  { %264 = vmatpush3.msra.mxu0 %v38_v4  ;;  %v214_v27 = vstv %s240_s1 }
  0x18   :  { %265 = vmatprep.subr.mxu0 %v330_v1  ;;  %v212_v26 = vstv %s31_s0  ;;  %p312_p8 = por %p311_p7, %p310_p6 }
  0x19   :  { %266 = vmatpush3.msra.mxu0 %v37_v5 }
  0x1a   :  { %267 = vmatprep.subr.mxu0 %v330_v1  ;;  %p313_p9 = pnand %p312_p8, %p306_p5 }
  0x1b   :  { %268 = vmatpush3.msra.mxu0 %v36_v6 }
  0x1c   :  { %269 = vmatprep.subr.mxu0 %v330_v1 }
  0x1d   :  { %270 = vmatpush3.msra.mxu0 %v35_v7 }
  0x1e   :  { %271 = vmatprep.subr.mxu0 %v330_v1 }
  0x1f   :  { %272 = vmatpush3.msra.mxu0 %v34_v8 }
  0x20   :  { %274 = vmatmul.mubr.msk.f32.vlgmr.msra.gmra.mxu0 %vm42_vm1, %v33_v9 }
  0xe0   :  { %v112_v11 = vpop.f32.mrf.mxu0 }
  0xe1   :  { %v116_v12 = vmax.f32 %v112_v11, 0.0 }
  0xe2   :  { %v275_v13 = vpop.f32.mrf.mxu0 }
  0xe3   :  { %279 = vmatmul.mubr.msk.f32.vlgmr.msra.gmra.mxu1 %vm118_vm3, %v116_v12 }
 0x1a3   :  { %v192_v14 = vpop.f32.mrf.mxu1 }
 0x1a4   :  { %v244_v15 = vmul.f32 -2.0, %v192_v14 }
 0x1a5   :  { %v280_v16 = vpop.f32.mrf.mxu1 }
 0x1a6   :  { %v198_v17 = vmul.f32 1.442695, %v244_v15 }
 0x1a8   :  { %285 = vpow2.f32 %v198_v17 }
 0x1b5   :  { %v286_v18 = vpop.eup %285 }
 0x1b6   :  { %v200_v19 = vadd.f32 1.0, %v286_v18 }
 0x1b8   :  { %287 = vrcp.f32 %v200_v19 }
 0x1c5   :  { %v288_v20 = vpop.eup %287 }
 0x1c6   :  { %v203_v21 = vmul.f32 %v288_v20, %v33_v9 }
 0x1c8   :  { %v204_v22 = vsel %vm42_vm1, %v203_v21, 0.0  ;;  %v209_v23 = vsel %vm42_vm1, %v203_v21, -inf }
 0x1c9   :  { %205 = vadd.xlane.f32.xlu0 %v204_v22 }
 0x1cd   :  { %210 = vmax.xlane.f32.xlu0 %v209_v23 }
 0x252   :  { %v206_v24 = vpop.xlane.xlu0 %205 }
 0x253   :  { %v208_v25 = vmul.f32 0.015625, %v206_v24 }
 0x255   :  { %v213_v29 = vmul.f32 %v212_v26, %v208_v25 }
 0x256   :  { %v211_v28 = vpop.xlane.xlu0 %210 }
 0x257   :  { %v215_v30 = vmul.f32 %v214_v27, %v211_v28 }
 0x259   :  { %v216_v31 = vadd.f32 %v215_v30, %v213_v29 }
 0x25b   :  { %v245_v32 = vmul.f32 -1.442695, %v216_v31 }
 0x25d   :  { %289 = vpow2.f32 %v245_v32 }
 0x26a   :  { %v290_v33 = vpop.eup %289 }
 0x26b   :  { %v220_v34 = vadd.f32 1.0, %v290_v33 }
 0x26d   :  { %291 = vrcp.f32 %v220_v34 }
 0x27a   :  { %v292_v35 = vpop.eup %291 }
 0x27b   :  { %v223_v36 = vmul.f32 %v292_v35, %v203_v21 }
 0x27d   :  { %224 = vst.msk [vmem:[#allocation5] sm:$0xff] %vm42_vm1, %v223_v36 }
 0x27e   :  { %316 = shalt.err (!%p313_p9)
}
 0x27f   :  { %234 = dma.vmem_to_hbm [thread:$0]  %s232_s13, 128, %s402_s4, [#allocation3]  }
 0x280   :  { %327 = dma.done.wait [#allocation3], 128  }
 0x281   :  { %328 = vsyncadd [#allocation3], 4294967168 }
 0x282   :  { %238 = vsyncpa [#allocation3], 1 }
 0x283   :  { %239 = vsyncpa [#allocation4], 1 }

</bundles_post_ra>
